<compile_context>
chip_gen: v7x
topology: tpu7x:2x2x1
jax: 0.10.0
libtpu: 0.0.40
codegen_flags: <defaults>
</compile_context>

<pallas_src>
import jax
import jax.numpy as jnp
from jax.experimental import pallas as pl
from jax.experimental.pallas import tpu as pltpu


def _outconv_kernel(x_ref, w_ref, b_ref, o_ref):
    # x_ref: (C_in, TM)   w_ref: (C_out, C_in)   b_ref: (C_out, 1)
    # o_ref: (C_out, TM)  -- lane-dense along the spatial (TM) axis.
    acc = jnp.dot(w_ref[...], x_ref[...], preferred_element_type=jnp.float32)
    acc = acc + b_ref[...].astype(jnp.float32)
    # Sigmoid epilogue: exp is EUP; the approximate reciprocal keeps the divide
    # on the EUP slot too (exact divide would burn VPU slots).  Overflow of exp
    # for very negative acc is benign (-> 0.0).
    o_ref[...] = pl.reciprocal(1.0 + jnp.exp(-acc), approx=True).astype(o_ref.dtype)


def outconv_pallas(x, weight, bias, *, target_block_bytes=4 * 1024 * 1024):
    """OutConv forward.  x: (N, C_in, H, W); weight: (C_out, C_in); bias: (C_out,)."""
    n, c_in, h, w = x.shape
    c_out = weight.shape[0]
    scale = c_in // 32
    assert scale >= 1, "in_channels must be >= 32 (scale_factor = in_channels // 32)"

    hw = h * w
    x3 = x.reshape(n, c_in, hw)  # free reshape, NCHW layout preserved

    # Spatial tile: largest lane-aligned (multiple-of-128) tile keeping the
    # input block near `target_block_bytes`.  4 MiB double-buffered = 8 MiB of
    # input buffers -- inside the scoped-VMEM defaults on v5e (16 MiB),
    # v6e (32 MiB) and v7x (32 MiB; note v7x has LESS VMEM than v6e, 64 MiB
    # physical).  On v7x's ~3.2 TB/s HBM, passing target_block_bytes=6-8 MiB
    # further amortizes the ~0.35 us per-grid-step overhead.
    itemsize = jnp.dtype(x.dtype).itemsize
    cap = max(128, (target_block_bytes // (c_in * itemsize)) // 128 * 128)
    tm = hw if hw <= cap else cap
    # No padding of x: the ragged tail block is masked by Pallas.  OOB input
    # lanes feed only the discarded output columns (the compute is purely
    # elementwise along the spatial axis -- do not add cross-lane reductions).
    num_tiles = pl.cdiv(hw, tm)

    w_mat = weight                   # (C_out, C_in)
    b_mat = bias.reshape(c_out, 1)   # (C_out, 1)

    cost = pl.CostEstimate(
        flops=2 * n * c_out * c_in * hw,
        transcendentals=n * c_out * hw,
        bytes_accessed=(n * c_in * hw + n * c_out * hw + c_out * c_in + c_out) * itemsize,
    )

    out3 = pl.pallas_call(
        _outconv_kernel,
        out_shape=jax.ShapeDtypeStruct((n, c_out, hw), x.dtype),
        grid_spec=pltpu.PrefetchScalarGridSpec(
            num_scalar_prefetch=0,
            # Spatial tiles first: the leading parallel axis has the larger
            # extent, giving a balanced split across v7x's 2 TensorCores.
            grid=(num_tiles, n),
            in_specs=[
                # Batch dim squeezed out; kernel sees (C_in, TM).
                pl.BlockSpec((None, c_in, tm), lambda j, b: (b, 0, j)),
                pl.BlockSpec((c_out, c_in), lambda j, b: (0, 0)),
                pl.BlockSpec((c_out, 1), lambda j, b: (0, 0)),
            ],
            out_specs=pl.BlockSpec((None, c_out, tm), lambda j, b: (b, 0, j)),
        ),
        compiler_params=pltpu.CompilerParams(
            dimension_semantics=("parallel", "parallel"),
            vmem_limit_bytes=32 * 1024 * 1024,
        ),
        cost_estimate=cost,
    )(x3, w_mat, b_mat)

    out = out3.reshape(n, c_out, h, w)

    # Nearest-neighbor upsample AFTER conv+sigmoid (exactly equivalent to the
    # PyTorch order, but on a tensor C_in/C_out times smaller).  Single fused
    # broadcast+reshape; no intermediate (N, C_out, H*scale, W) pass in HBM.
    if scale > 1:
        out = jnp.broadcast_to(
            out[:, :, :, None, :, None],
            (n, c_out, h, scale, w, scale),
        ).reshape(n, c_out, h * scale, w * scale)
    return out


def _reference(x, weight, bias):
    # Literal translation of the PyTorch module: upsample -> 1x1 conv -> sigmoid.
    scale = x.shape[1] // 32
    x_up = jnp.repeat(jnp.repeat(x, scale, axis=2), scale, axis=3)
    y = jnp.einsum("nchw,oc->nohw", x_up, weight) + bias[None, :, None, None]
    return jax.nn.sigmoid(y)


if __name__ == "__main__":
    # in_channels must be >= 32 for a valid scale factor; in_channels=64 -> scale=2.
    N, C_IN, C_OUT, H, W = 2, 64, 2, 8, 8

    key = jax.random.PRNGKey(0)
    kx, kw, kb = jax.random.split(key, 3)

    x = jax.random.normal(kx, (N, C_IN, H, W), dtype=jnp.float32)
    bound = 1.0 / (C_IN ** 0.5)
    weight = jax.random.uniform(kw, (C_OUT, C_IN), jnp.float32, -bound, bound)
    bias = jax.random.uniform(kb, (C_OUT,), jnp.float32, -bound, bound)

    out = jax.block_until_ready(outconv_pallas(x, weight, bias))
    ref = _reference(x, weight, bias)
    scale = C_IN // 32
    assert out.shape == (N, C_OUT, H * scale, W * scale)
    # Tolerance covers the approximate EUP reciprocal in the sigmoid epilogue
    # (use approx=False in the kernel for bit-level parity); structural bugs
    # would show errors orders of magnitude larger.
    assert jnp.allclose(out, ref, atol=5e-3, rtol=0.0), float(jnp.max(jnp.abs(out - ref)))

    # Second check: exercise the no-pad ragged spatial tail (hw=160, 128-lane tile).
    H2, W2 = 8, 20
    x2 = jax.random.normal(jax.random.PRNGKey(1), (N, C_IN, H2, W2), dtype=jnp.float32)
    out2 = jax.block_until_ready(
        outconv_pallas(x2, weight, bias, target_block_bytes=128 * C_IN * 4))
    ref2 = _reference(x2, weight, bias)
    assert out2.shape == (N, C_OUT, H2 * scale, W2 * scale)
    assert jnp.allclose(out2, ref2, atol=5e-3, rtol=0.0), float(jnp.max(jnp.abs(out2 - ref2)))

    print("KERNEL_OK")
</pallas_src>

<mosaic_0001>
module attributes {stable_mosaic.version = 11 : i64} {
  func.func @_outconv_kernel(%arg0: i32, %arg1: i32, %arg2: memref<1x64x64xf32, #tpu.memory_space<vmem>>, %arg3: memref<2x64xf32, #tpu.memory_space<vmem>>, %arg4: memref<2x1xf32, #tpu.memory_space<vmem>>, %arg5: memref<1x2x64xf32, #tpu.memory_space<vmem>>) attributes {dimension_semantics = [#tpu.dimension_semantics<parallel>, #tpu.dimension_semantics<parallel>], iteration_bounds = array<i64: 1, 2>, scalar_prefetch = 0 : i64, scratch_operands = 0 : i64, tpu.core_type = #tpu.core_type<tc>, window_params = [{transform_indices = @transform_0, window_bounds = array<i64: 1, 64, 64>}, {pipeline_mode = #tpu.pipeline_mode<synchronous>, transform_indices = @transform_1, window_bounds = array<i64: 2, 64>}, {pipeline_mode = #tpu.pipeline_mode<synchronous>, transform_indices = @transform_2, window_bounds = array<i64: 2, 1>}, {transform_indices = @transform_3, window_bounds = array<i64: 1, 2, 64>}]} {
    %c0 = arith.constant 0 : index
    %c0_0 = arith.constant 0 : index
    %0 = vector.load %arg3[%c0, %c0_0] : memref<2x64xf32, #tpu.memory_space<vmem>>, vector<2x64xf32>
    %c0_1 = arith.constant 0 : index
    %c0_2 = arith.constant 0 : index
    %c0_3 = arith.constant 0 : index
    %1 = vector.load %arg2[%c0_1, %c0_2, %c0_3] : memref<1x64x64xf32, #tpu.memory_space<vmem>>, vector<1x64x64xf32>
    %2 = vector.shape_cast %1 : vector<1x64x64xf32> to vector<64x64xf32>
    %cst = arith.constant dense<0.000000e+00> : vector<2x64xf32>
    %3 = tpu.matmul %0, %2, %cst {dimension_numbers = #tpu.dot_dimension_numbers<[1], [0], [0], [1], [0, 0, 1, 1], [], []>} : vector<2x64xf32>, vector<64x64xf32>, vector<2x64xf32> -> vector<2x64xf32>
    %c0_4 = arith.constant 0 : index
    %c0_5 = arith.constant 0 : index
    %4 = vector.load %arg4[%c0_4, %c0_5] : memref<2x1xf32, #tpu.memory_space<vmem>>, vector<2x1xf32>
    %5 = vector.broadcast %4 : vector<2x1xf32> to vector<2x64xf32>
    %6 = arith.addf %3, %5 : vector<2x64xf32>
    %cst_6 = arith.constant 0.000000e+00 : f32
    %7 = vector.broadcast %cst_6 : f32 to vector<2x64xf32>
    %8 = arith.subf %7, %6 : vector<2x64xf32>
    %9 = math.exp %8 : vector<2x64xf32>
    %cst_7 = arith.constant 1.000000e+00 : f32
    %10 = vector.broadcast %cst_7 : f32 to vector<2x64xf32>
    %11 = arith.addf %10, %9 : vector<2x64xf32>
    %12 = tpu.reciprocal %11 {approx = true} : vector<2x64xf32> -> vector<2x64xf32>
    %c0_8 = arith.constant 0 : index
    %c0_9 = arith.constant 0 : index
    %c0_10 = arith.constant 0 : index
    %13 = vector.load %arg5[%c0_8, %c0_9, %c0_10] : memref<1x2x64xf32, #tpu.memory_space<vmem>>, vector<1x2x64xf32>
    %14 = vector.shape_cast %13 : vector<1x2x64xf32> to vector<2x64xf32>
    %15 = vector.shape_cast %12 : vector<2x64xf32> to vector<1x2x64xf32>
    tpu.vector_store %arg5[%c0_8, %c0_9, %c0_10], %15 {strides = array<i32>} : memref<1x2x64xf32, #tpu.memory_space<vmem>>, vector<1x2x64xf32>,
    return
  }
  func.func @transform_0(%arg0: i32, %arg1: i32) -> (i32, i32, i32) {
    %c0_i32 = arith.constant 0 : i32
    %c0_i32_0 = arith.constant 0 : i32
    return %arg1, %c0_i32, %arg0 : i32, i32, i32
  }
  func.func @transform_1(%arg0: i32, %arg1: i32) -> (i32, i32) {
    %c0_i32 = arith.constant 0 : i32
    %c0_i32_0 = arith.constant 0 : i32
    %c0_i32_1 = arith.constant 0 : i32
    return %c0_i32, %c0_i32_0 : i32, i32
  }
  func.func @transform_2(%arg0: i32, %arg1: i32) -> (i32, i32) {
    %c0_i32 = arith.constant 0 : i32
    %c0_i32_0 = arith.constant 0 : i32
    %c0_i32_1 = arith.constant 0 : i32
    return %c0_i32, %c0_i32_0 : i32, i32
  }
  func.func @transform_3(%arg0: i32, %arg1: i32) -> (i32, i32, i32) {
    %c0_i32 = arith.constant 0 : i32
    %c0_i32_0 = arith.constant 0 : i32
    return %arg1, %c0_i32, %arg0 : i32, i32, i32
  }
}

</mosaic_0001>

<bundles_post_ra>
// kernel: tpu_custom_call.1
= control target key start
LH: loop header
LB: loop body
LE: loop exit
PB: predicated region body
PF: predicated region fallthrough
CT: control target
= control target key end

     0   :  { %8 = vsyncpa [#allocation3], 0  ;;  %s849_s0 = inlined_call_operand.hbm [shape: f32[2,64,64], index: 0, kind: input, shape index: {}]   ;;  %s850_s1 = inlined_call_operand.vmem [shape: f32[2,64], index: 1, kind: input, shape index: {}]   ;;  %s851_s2 = inlined_call_operand.vmem [shape: f32[2,1], index: 2, kind: input, shape index: {}]   ;;  %s852_s3 = inlined_call_operand.hbm [shape: f32[2,2,64], index: 3, kind: output, shape index: {}]  }
   0x1   :  { %10 = vsyncpa [#allocation3 + $0x1], 0 }
   0x2   :  { %11 = vsyncpa [#allocation4], 0 }
   0x3   :  { %13 = vsyncpa [#allocation4 + $0x1], 0  ;;  %s669_s12 = smov 0   ;;  %s671_s13 = smov 0  }
   0x4   :  { %s673_s14 = smov 0   ;;  %s675_s15 = smov 0  }
   0x5   :  { %s677_s16 = smov 0   ;;  %s679_s17 = smov 0  }
   0x6 LB: > { %s398_s18 = sadd.s32 4294967295, %s639_s17   ;;  %s399_s19 = sadd.s32 4294967294, %s639_s17   ;;  %s639_s17 = sphi %s679_s17, %s19_s17   ;;  %s635_s16 = sphi %s677_s16, %s867_s16   ;;  %s631_s15 = sphi %s675_s15, %s866_s15   ;;  %s627_s14 = sphi %s673_s14, %s865_s14   ;;  %s623_s13 = sphi %s671_s13, %s864_s13   ;;  %s619_s12 = sphi %s669_s12, %s863_s12  }
   0x7   : > { %s28_s20 = sadd.s32 1, %s635_s16  ;;  %s40_s21 = sadd.s32 1, %s627_s14 }
   0x8   : > { %p29_p0 = scmp.ge.s32.totalorder %s28_s20, 2  ;;  %p47_p1 = scmp.ne.s32.totalorder %s627_s14, %s623_s13 }
   0x9   : > { %p48_p2 = scmp.eq.s32.totalorder %s639_s17, 0  ;;  %p53_p3 = scmp.ne.s32.totalorder %s623_s13, %s619_s12 }
   0xa   : > { %s869_s20 = smov (%p29_p0, %s28_s20), 0  ;;  %p54_p5 = scmp.eq.s32.totalorder %s398_s18, 0 }
   0xb   : > { %p710_p4 = por %p48_p2, %p47_p1  ;;  %s35_s23 = ssub.s32 %s635_s16, %s869_s20 }
   0xc   : > { %p121_p6 = scmp.eq.s32.totalorder %s398_s18, 1  ;;  %p38_p7 = scmp.eq.s32.totalorder %s35_s23, 0 }
   0xd   : > { %p716_p8 = por %p54_p5, %p53_p3  ;;  %p127_p10 = scmp.eq.s32.totalorder %s399_s19, 1 }
   0xe   : > { %p720_p9 = por %p121_p6, %p47_p1  ;;  %p466_p13 = scmp.lt.s32.totalorder %s639_s17, 2 }
   0xf   : > { %s725_s26 = scalar_select %p38_p7, %s627_s14, %s40_s21  }
  0x10   : > { %s856_s25 = scalar_select %p720_p9, 1, 0 }
  0x11   : > { %p727_p11 = por %p127_p10, %p53_p3  ;;  %s153_s28 = sand.u32 1, %s627_s14  }
  0x12   : > { %s402_s29 = sshll.u32 %s153_s28, 6  ;;  %s413_s30 = sshll.u32 %s635_s16, 10 }
  0x13   : > { %s857_s27 = scalar_select %p727_p11, 1, 0 }
  0x14   : > { %s738_s6 = scalar_lea.hbm %s849_s0, %s413_s30  ;;  %s157_s7 = scalar_lea.vmem [#allocation2], %s402_s29 }
  0x15   : > { %s165_s8 = sshll.u32 %s157_s7, 4  ;;  %p744_p0 = pnand %p466_p13, %p710_p4  ;;  %s740_s8 = int_to_ptr.vmem [resolvable:$true] %s165_s8 }
  0x16   : > { %s749_s10 = scalar_lea.sflag [#allocation3], %s153_s28  ;;  %s527_s11 = scalar_lea.hbm %s738_s6, 1024 }
  0x17   : > { %p528_p2 = scmp.ne.s32.totalorder %s738_s6, %s527_s11  ;;  %p529_p3 = pneg %p744_p0 }
  0x18   : > { %s532_s21 = scalar_lea.hbm %s849_s0, 2048  ;;  %p533_p4 = scmp.lt.u32.totalorder %s738_s6, %s849_s0 }
  0x19   : > { %p530_p5 = pnand %p529_p3, %p528_p2  ;;  %p534_p7 = scmp.lt.u32.totalorder %s532_s21, %s527_s11 }
  0x1a   : > { %p536_p13 = scmp.lt.u32.totalorder %s527_s11, %s738_s6 }
  0x1b   : > { %p531_p6 = pneg %p530_p5  ;;  %p535_p10 = por %p534_p7, %p533_p4 }
  0x1d   : > { %p537_p12 = por %p536_p13, %p535_p10 }
  0x1f   : > { %p538_p1 = pnand %p537_p12, %p531_p6 }
  0x21   : > { %541 = shalt.err (!%p538_p1)
}
  0x22   : > { %s542_s28 = scalar_lea.vmem %s740_s8, 1024  ;;  %s641_s29 = smov [#allocation2]  }
  0x23   : > { %p543_p2 = scmp.ne.s32.totalorder %s740_s8, %s542_s28  ;;  %s547_s30 = sshll.u32 %s641_s29, 4  ;;  %s548_s30 = int_to_ptr.vmem [resolvable:$false] %s547_s30 }
  0x24   : > { %s549_s4 = scalar_lea.vmem %s548_s30, 2048  ;;  %p550_p9 = scmp.lt.s32.totalorder %s740_s8, %s548_s30 }
  0x25   : > { %p545_p5 = pnand %p543_p2, %p529_p3  ;;  %p551_p4 = scmp.lt.s32.totalorder %s549_s4, %s542_s28 }
  0x27   : > { %p546_p11 = pneg %p545_p5  ;;  %p552_p7 = por %p551_p4, %p550_p9 }
  0x29   : > { %p553_p10 = pnand %p552_p7, %p546_p11 }
  0x2b   : > { %556 = shalt.err (!%p553_p10)
}
  0x2c   : > { %s642_s5 = smov 128   ;;  %s643_s7 = smov 8  }
  0x2d   : > { %461 = dma.hbm_to_vmem [thread:$0]  (!%p744_p0), %s738_s6, 1024, %s740_s8, %s749_s10, %s642_s5, %s642_s5, %s643_s7  }
  0x2e   : > { %p173_p12 = scmp.lt.s32.totalorder %s639_s17, 3  ;;  %p859_p1 = scmp.ge.s32.totalorder %s639_s17, 1 }
  0x30   : > { %p174_p3 = pnand %p859_p1, %p173_p12 }
  0x31   : > { %s781_s11 = sand.u32 (!%p174_p3), 1, %s623_s13  }
  0x32   : > { %177 = sbr.rel (%p174_p3) target bundleno = 333 (0x14d), region = 32  ;;  %s406_s18 = sshll.u32 (!%p174_p3), %s781_s11, 6 }
  0x33   : > { %s180_s19 = scalar_lea.sflag (!%p174_p3), [#allocation3], %s781_s11  ;;  %s183_s21 = scalar_lea.vmem (!%p174_p3), [#allocation2], %s406_s18 }
  0x39   : > { %610 = dma.done.wait (%p716_p8), %s180_s19, 1024  }
  0x3a   : > { %612 = vsyncadd (%p716_p8), %s180_s19, 4294966272  ;;  %v644_v0 = vmov 0.0|0.0   ;;  %vm645_vm0 = vmmov 0   ;;  %v646_v1 = vmov 0.0   ;;  %v647_v2 = vmov 0   ;;  %v207_v3 = vld [vmem:[%s183_s21] sm:$0xff] }
  0x3b   : > { %442 = vmatprep.subr.bf16.mxu0 %v644_v0  ;;  %439 = vmatprep.mubr.msk.f32.mxu0 %vm645_vm0, %v646_v1  ;;  %v208_v4 = vld [vmem:[%s183_s21 + $0x8] sm:$0xff]  ;;  %v209_v5 = vld [vmem:[%s183_s21 + $0x10] sm:$0xff]  ;;  %v210_v7 = vld [vmem:[%s183_s21 + $0x18] sm:$0xff]  ;;  %vm221_vm1 = vcmask 523264   ;;  %s407_s10 = sshll.u32 %s781_s11, 1  ;;  %s410_s22 = sshll.u32 %s631_s15, 5 }
  0x3c   : > { %522 = vset.pattern.permute.xlu0 %v647_v2  ;;  %v443_v6 = vpack.c.bf16 %v208_v4, %v207_v3  ;;  %v446_v8 = vpack.c.bf16 %v210_v7, %v209_v5  ;;  %v215_v9 = vld [vmem:[%s851_s2] sm:$0x3]  ;;  %v212_v11 = vld [vmem:[%s183_s21 + $0x28] sm:$0xff]  ;;  %v213_v13 = vld [vmem:[%s183_s21 + $0x30] sm:$0xff]  ;;  %s205_s23 = scalar_lea.vmem [#allocation5], %s407_s10  ;;  %vm300_vm2 = vcmask 517120   ;;  %s800_s4 = scalar_lea.hbm %s852_s3, %s410_s22 }
  0x3d   : > { %v211_v10 = vld [vmem:[%s183_s21 + $0x20] sm:$0xff]  ;;  %218 = vperm.xlu0 %522, %v215_v9   ;;  %v214_v14 = vld [vmem:[%s183_s21 + $0x38] sm:$0xff]  ;;  %s317_s28 = sshll.u32 %s205_s23, 4  ;;  %s303_s5 = scalar_lea.sflag [#allocation4], %s781_s11  ;;  %s802_s28 = int_to_ptr.vmem [resolvable:$true] %s317_s28 }
  0x3e   : > { %444 = vmatpush3.bf16.msra.mxu0 %v443_v6  ;;  %v449_v12 = vpack.c.bf16 %v212_v11, %v211_v10  ;;  %v452_v15 = vpack.c.bf16 %v214_v14, %v213_v13  ;;  %v206_v16 = vld [vmem:[%s850_s1] sm:$0x3]  ;;  %s557_s7 = scalar_lea.vmem %s802_s28, 32  ;;  %p860_p9 = scmp.ne.s32.totalorder %s856_s25, 0 }
  0x3f   : > { %445 = vmatprep.subr.bf16.mxu0 %v644_v0  ;;  %p558_p8 = scmp.ne.s32.totalorder %s802_s28, %s557_s7  ;;  %s648_s15 = smov [#allocation5]  }
  0x40   : > { %s561_s18 = sshll.u32 %s648_s15, 4  ;;  %s562_s18 = int_to_ptr.vmem [resolvable:$false] %s561_s18 }
  0x41   : > { %p559_p11 = pnand %p558_p8, %p860_p9  ;;  %s563_s19 = scalar_lea.vmem %s562_s18, 64 }
  0x42   : > { %447 = vmatpush3.bf16.msra.mxu0 %v446_v8  ;;  %p564_p6 = scmp.lt.s32.totalorder %s802_s28, %s562_s18  ;;  %p565_p13 = scmp.lt.s32.totalorder %s563_s19, %s557_s7 }
  0x43   : > { %448 = vmatprep.subr.bf16.mxu0 %v644_v0  ;;  %p560_p0 = pneg %p559_p11 }
  0x44   : > { %p566_p2 = por %p565_p13, %p564_p6 }
  0x46   : > { %450 = vmatpush3.bf16.msra.mxu0 %v449_v12  ;;  %p567_p5 = pnand %p566_p2, %p560_p0 }
  0x47   : > { %451 = vmatprep.subr.bf16.mxu0 %v644_v0 }
  0x4a   : > { %453 = vmatpush3.bf16.msra.mxu0 %v452_v15 }
  0x4d   : > { %440 = vmatmul.mubr.msk.f32.vlgmr.msra.gmra.mrb[0].mxu0 %vm221_vm1, %v206_v16 }
  0xbc   : > { %v219_v17 = vpop.permute.xlu0 %218 }
 0x120   : > { %v291_v18 = vpop.f32.mrb[0].mxu0 }
 0x121   : > { %v292_v19 = vadd.f32 %v291_v18, %v219_v17  ;;  %v441_v20 = vpop.f32.mrb[1].mxu0 }
 0x123   : > { %v295_v21 = vsub.f32 0.0, %v292_v19 }
 0x125   : > { %v296_v22 = vmul.f32 1.442695, %v295_v21 }
 0x127   : > { %523 = vpow2.f32 %v296_v22 }
 0x131   : > { %v524_v23 = vpop.eup %523 }
 0x132   : > { %v298_v24 = vadd.f32 1.0, %v524_v23 }
 0x134   : > { %525 = vrcp.f32 %v298_v24 }
 0x13e   : > { %v526_v25 = vpop.eup %525 }
 0x13f   : > { %301 = vst.msk [vmem:[%s205_s23] sm:$0x3] %vm300_vm2, %v526_v25 }
 0x140   : > { %570 = shalt.err (!%p567_p5)
}
 0x141   : > { %s571_s11 = scalar_lea.hbm %s800_s4, 32  ;;  %s575_s8 = scalar_lea.hbm %s852_s3, 64 }
 0x142   : > { %p572_p4 = scmp.ne.s32.totalorder %s800_s4, %s571_s11  ;;  %p576_p12 = scmp.lt.u32.totalorder %s800_s4, %s852_s3 }
 0x143   : > { %p577_p1 = scmp.lt.u32.totalorder %s575_s8, %s571_s11  ;;  %p579_p8 = scmp.lt.u32.totalorder %s571_s11, %s800_s4 }
 0x144   : > { %p573_p7 = pnand %p572_p4, %p860_p9 }
 0x145   : > { %p578_p3 = por %p577_p1, %p576_p12 }
 0x146   : > { %p574_p10 = pneg %p573_p7 }
 0x147   : > { %p580_p11 = por %p579_p8, %p578_p3 }
 0x149   : > { %p581_p0 = pnand %p580_p11, %p574_p10 }
 0x14b   : > { %584 = shalt.err (!%p581_p0)
}
 0x14c   : > { %456 = dma.vmem_to_hbm [thread:$0]  (%p860_p9), %s802_s28, 32, %s800_s4, %s303_s5  }
 0x14d PF: > { %s329_s10 = sand.u32 1, %s619_s12   ;;  %p861_p6 = scmp.ne.s32.totalorder %s857_s27, 0 }
 0x14e   : > { %p862_p13 = scmp.ge.s32.totalorder %s639_s17, 2  ;;  %s330_s22 = scalar_lea.sflag [#allocation4], %s329_s10 }
 0x150   : > { %p463_p2 = pnand %p862_p13, %p861_p6 }
 0x152   : > { %614 = dma.done.wait (!%p463_p2), %s330_s22, 32  }
 0x153   : > { %616 = vsyncadd (!%p463_p2), %s330_s22, 4294967264  ;;  %s19_s17 = sadd.s32 1, %s639_s17   ;;  %s863_s12 = smov %s623_s13 }
 0x154   : > { %p16_p5 = scmp.ge.s32.totalorder %s19_s17, 4   ;;  %s864_s13 = smov %s627_s14 }
 0x155   : > { %s865_s14 = smov %s725_s26  ;;  %s866_s15 = smov %s635_s16 }
 0x156   : > { %s867_s16 = smov %s869_s20  ;;  %18 = sbr.rel (!%p16_p5) target bundleno = 6 (0x6), region = 77 }
 0x15d   :  { %335 = vsyncpa [#allocation3], 1 }
 0x15e   :  { %337 = vsyncpa [#allocation3 + $0x1], 1 }
 0x15f   :  { %338 = vsyncpa [#allocation4], 1 }
 0x160   :  { %340 = vsyncpa [#allocation4 + $0x1], 1 }

</bundles_post_ra>
